<compile_context>
chip_gen: v5e
topology: v5e:2x2
jax: 0.10.0
libtpu: 0.0.40
codegen_flags: <defaults>
</compile_context>

<pallas_src>
import math
import numpy as np
import jax
import jax.numpy as jnp
from jax.experimental import pallas as pl
from jax.experimental.pallas import tpu as pltpu


# 9 fixed basis stencils (3x3), L2-normalised -- a frozen buffer in the module.
_BASIS = np.array(
    [[[0.0, 0.0, 0.0], [0.0, 1.0, 0.0], [0.0, 0.0, 0.0]],
     [[0.0, 0.0, 0.0], [-0.5, 0.0, 0.5], [0.0, 0.0, 0.0]],
     [[0.0, 0.5, 0.0], [0.0, 0.0, 0.0], [0.0, -0.5, 0.0]],
     [[0.0, 0.0, 0.0], [1.0, -2.0, 1.0], [0.0, 0.0, 0.0]],
     [[0.0, 1.0, 0.0], [0.0, -2.0, 0.0], [0.0, 1.0, 0.0]],
     [[-0.25, 0.0, 0.25], [0.0, 0.0, 0.0], [0.25, 0.0, -0.25]],
     [[0.5, -1.0, 0.5], [0.0, 0.0, 0.0], [-0.5, 1.0, -0.5]],
     [[-0.5, 0.0, 0.5], [1.0, 0.0, -1.0], [-0.5, 0.0, 0.5]],
     [[1.0, -2.0, 1.0], [-2.0, 4.0, -2.0], [1.0, -2.0, 1.0]]],
    dtype=np.float64)
_BASIS = _BASIS / np.sqrt((_BASIS ** 2).sum(axis=(1, 2), keepdims=True))

_EPS = 1e-5  # GroupNorm default epsilon
_TAPS = [(dh, dw) for dh in (-1, 0, 1) for dw in (-1, 0, 1)]


# ------------------------------------------------------------------ kernel ---
def _make_kernel(H, W, nb):
    HW = H * W

    def kernel(x_ref, pos_ref, w_ref, b_ref, o_ref):
        # x_ref:   (nb, C, H*W)    images, NCHW with flattened spatial (lanes)
        # pos_ref: (2, H*W) int32  row 0: w-index, row 1: h-index of each pixel
        # w_ref:   (Cout, 9*C)     1x1-conv weight (k-major / c-minor features)
        # b_ref:   (Cout, 1)       bias
        # o_ref:   (nb, Cout, H*W)
        C = x_ref.shape[1]
        wpos = pos_ref[0:1, :]                         # (1, HW)
        hpos = pos_ref[1:2, :]                         # (1, HW)

        for i in range(nb):
            x = x_ref[i]                               # (C, HW) float32

            # ---- 9 shifted taps: wrap-around lane shift + border masking ----
            tap_vals = []
            for (dh, dw) in _TAPS:
                off = (dh * W + dw) % HW               # result[:, s] = x[:, s + dh*W + dw]
                if off == 0:
                    y = x
                else:
                    y = jnp.concatenate([x[:, off:], x[:, :off]], axis=1)
                # zero pixels whose (h+dh, w+dw) falls outside the image
                cond = None
                if dh == -1:
                    cond = hpos >= 1
                elif dh == 1:
                    cond = hpos <= H - 2
                if dw == -1:
                    c2 = wpos >= 1
                    cond = c2 if cond is None else (cond & c2)
                elif dw == 1:
                    c2 = wpos <= W - 2
                    cond = c2 if cond is None else (cond & c2)
                if cond is not None:
                    y = jnp.where(cond, y, 0.0)
                tap_vals.append(y)

            # ---- basis features: x1[k*C + c] = sum_t BASIS[k,t] * tap_t[c] ----
            feats = []
            for k in range(9):
                acc = None
                for t, (dh, dw) in enumerate(_TAPS):
                    coef = float(_BASIS[k, dh + 1, dw + 1])
                    if coef == 0.0:
                        continue
                    term = tap_vals[t] if coef == 1.0 else tap_vals[t] * coef
                    acc = term if acc is None else acc + term
                feats.append(acc)
            x1 = jnp.concatenate(feats, axis=0)        # (9*C, HW), k-major/c-minor

            # ---- GroupNorm(1, 9*C, affine=False): per-image layer norm -------
            mu = jnp.mean(x1)
            xc = x1 - mu
            var = jnp.mean(xc * xc)
            x1n = xc * jax.lax.rsqrt(var + _EPS)

            # ---- 1x1 conv: one MXU matmul over all 9*C features + bias -------
            out = jnp.dot(w_ref[...], x1n, preferred_element_type=jnp.float32)
            out = out + b_ref[...]                     # (Cout, 1) broadcast
            o_ref[i] = out.astype(o_ref.dtype)

    return kernel


# ----------------------------------------------------------------- wrapper ---
def conv4_forward(x_nchw, weight, bias=None, stride=1, images_per_block=None):
    """Forward pass of the conv4 module.

    x_nchw: (N, C, H, W) float32
    weight: (Cout, 9*C, 1, 1) or (Cout, 9*C) float32 (PyTorch 1x1-conv layout)
    bias:   (Cout,) float32 or None
    """
    N, C, H, W = x_nchw.shape
    HW = H * W
    w2 = jnp.reshape(weight, (weight.shape[0], -1)).astype(jnp.float32)
    Cout, F = w2.shape
    assert F == 9 * C, f"weight feature dim {F} != 9*C ({9 * C})"

    if images_per_block is None:
        # >=2 grid steps keeps both v7x TensorCores busy; for large batches,
        # bigger blocks amortise the ~0.35us per-grid-step overhead.
        images_per_block = 1 if N <= 8 else max(1, N // 8)
    if N % images_per_block != 0:
        images_per_block = 1
    nb = images_per_block
    grid = (N // nb,)

    # Boundary glue only: NCHW -> (N, C, H*W) is a trailing reshape (no transpose,
    # no jnp.pad -- "same" padding is done by masking inside the kernel).
    x_flat = jnp.reshape(x_nchw, (N, C, HW)).astype(jnp.float32)
    b2 = (jnp.zeros((Cout, 1), jnp.float32) if bias is None
          else jnp.reshape(bias, (Cout, 1)).astype(jnp.float32))

    # Static pixel coordinates used by the in-kernel border masks.
    cols = np.arange(HW, dtype=np.int32)
    pos = jnp.asarray(np.stack([cols % W, cols // W], axis=0))   # (2, HW) int32

    out_flat = pl.pallas_call(
        _make_kernel(H, W, nb),
        out_shape=jax.ShapeDtypeStruct((N, Cout, HW), jnp.float32),
        grid=grid,
        in_specs=[
            pl.BlockSpec((nb, C, HW), lambda g: (g, 0, 0)),
            pl.BlockSpec((2, HW), lambda g: (0, 0)),
            pl.BlockSpec((Cout, F), lambda g: (0, 0)),
            pl.BlockSpec((Cout, 1), lambda g: (0, 0)),
        ],
        out_specs=pl.BlockSpec((nb, Cout, HW), lambda g: (g, 0, 0)),
        compiler_params=pltpu.CompilerParams(
            dimension_semantics=("parallel",)),
    )(x_flat, pos, w2, b2)

    out = jnp.reshape(out_flat, (N, Cout, H, W))
    if stride != 1:
        # 1x1 conv with padding=0 and stride s == spatial subsampling.
        out = out[:, :, ::stride, ::stride]
    return out


# -------------------------------------------------------------------- main ---
if __name__ == "__main__":
    N, Cin, Cout, H, W = 2, 4, 8, 16, 16
    stride = 1

    key = jax.random.PRNGKey(0)
    k_x, k_w, k_b = jax.random.split(key, 3)

    x = jax.random.normal(k_x, (N, Cin, H, W), dtype=jnp.float32)
    # weight init matches __init__: 1/(3*sqrt(Cin)) * randn(Cout, 9*Cin, 1, 1)
    weight = (1.0 / (3.0 * math.sqrt(Cin))) * jax.random.normal(
        k_w, (Cout, 9 * Cin, 1, 1), dtype=jnp.float32)
    # module initialises bias to zeros; use small random values to exercise the add
    bias = 0.1 * jax.random.normal(k_b, (Cout,), dtype=jnp.float32)

    out = conv4_forward(x, weight, bias, stride=stride)
    out = jax.block_until_ready(out)
    assert out.shape == (N, Cout, H, W)

    # ---- reference (pure XLA, mirrors the PyTorch module step-for-step) ----
    basis = jnp.asarray(_BASIS, dtype=jnp.float32)              # (9, 3, 3)
    eyec = jnp.eye(Cin, dtype=jnp.float32)
    big_k = jnp.einsum('kij,cd->kcdij', basis, eyec).reshape(9 * Cin, Cin, 3, 3)
    x1 = jax.lax.conv_general_dilated(
        x, big_k, window_strides=(1, 1), padding=((1, 1), (1, 1)),
        dimension_numbers=('NCHW', 'OIHW', 'NCHW'))             # (N, 9*Cin, H, W)
    mu = jnp.mean(x1, axis=(1, 2, 3), keepdims=True)
    var = jnp.mean(jnp.square(x1 - mu), axis=(1, 2, 3), keepdims=True)
    x1n = (x1 - mu) / jnp.sqrt(var + _EPS)
    ref = jax.lax.conv_general_dilated(
        x1n, weight.reshape(Cout, 9 * Cin, 1, 1),
        window_strides=(stride, stride), padding='VALID',
        dimension_numbers=('NCHW', 'OIHW', 'NCHW')) + bias[None, :, None, None]

    max_err = float(jnp.max(jnp.abs(out - ref)))
    assert jnp.allclose(out, ref, atol=1e-4, rtol=1e-4), f"max abs err {max_err}"

    print("KERNEL_OK")
</pallas_src>

<mosaic_0001>
module attributes {stable_mosaic.version = 11 : i64} {
  func.func @kernel(%arg0: i32, %arg1: memref<1x4x256xf32, #tpu.memory_space<vmem>>, %arg2: memref<2x256xi32, #tpu.memory_space<vmem>>, %arg3: memref<8x36xf32, #tpu.memory_space<vmem>>, %arg4: memref<8x1xf32, #tpu.memory_space<vmem>>, %arg5: memref<1x8x256xf32, #tpu.memory_space<vmem>>) attributes {dimension_semantics = [#tpu.dimension_semantics<parallel>], iteration_bounds = array<i64: 2>, scalar_prefetch = 0 : i64, scratch_operands = 0 : i64, tpu.core_type = #tpu.core_type<tc>, window_params = [{transform_indices = @transform_0, window_bounds = array<i64: 1, 4, 256>}, {pipeline_mode = #tpu.pipeline_mode<synchronous>, transform_indices = @transform_1, window_bounds = array<i64: 2, 256>}, {pipeline_mode = #tpu.pipeline_mode<synchronous>, transform_indices = @transform_2, window_bounds = array<i64: 8, 36>}, {pipeline_mode = #tpu.pipeline_mode<synchronous>, transform_indices = @transform_3, window_bounds = array<i64: 8, 1>}, {transform_indices = @transform_4, window_bounds = array<i64: 1, 8, 256>}]} {
    %c0 = arith.constant 0 : index
    %c0_0 = arith.constant 0 : index
    %0 = vector.load %arg2[%c0, %c0_0] : memref<2x256xi32, #tpu.memory_space<vmem>>, vector<1x256xi32>
    %c1 = arith.constant 1 : index
    %c0_1 = arith.constant 0 : index
    %1 = vector.load %arg2[%c1, %c0_1] : memref<2x256xi32, #tpu.memory_space<vmem>>, vector<1x256xi32>
    %c0_2 = arith.constant 0 : index
    %c0_3 = arith.constant 0 : index
    %c0_4 = arith.constant 0 : index
    %2 = vector.load %arg1[%c0_2, %c0_3, %c0_4] : memref<1x4x256xf32, #tpu.memory_space<vmem>>, vector<1x4x256xf32>
    %3 = vector.shape_cast %2 : vector<1x4x256xf32> to vector<4x256xf32>
    %4 = vector.extract_strided_slice %3 {offsets = [0, 239], sizes = [4, 17], strides = [1, 1]} : vector<4x256xf32> to vector<4x17xf32>
    %5 = vector.extract_strided_slice %3 {offsets = [0, 0], sizes = [4, 239], strides = [1, 1]} : vector<4x256xf32> to vector<4x239xf32>
    %6 = tpu.concatenate %4, %5 in 1 : vector<4x17xf32>, vector<4x239xf32> -> vector<4x256xf32>
    %c1_i32 = arith.constant 1 : i32
    %7 = vector.broadcast %c1_i32 : i32 to vector<1x256xi32>
    %8 = arith.cmpi sge, %1, %7 : vector<1x256xi32>
    %c1_i32_5 = arith.constant 1 : i32
    %9 = vector.broadcast %c1_i32_5 : i32 to vector<1x256xi32>
    %10 = arith.cmpi sge, %0, %9 : vector<1x256xi32>
    %11 = arith.andi %8, %10 : vector<1x256xi1>
    %cst = arith.constant 0.000000e+00 : f32
    %12 = vector.shape_cast %11 : vector<1x256xi1> to vector<1x256xi1>
    %13 = vector.broadcast %12 : vector<1x256xi1> to vector<4x256xi1>
    %14 = vector.broadcast %cst : f32 to vector<4x256xf32>
    %15 = arith.select %13, %6, %14 : vector<4x256xi1>, vector<4x256xf32>
    %16 = vector.extract_strided_slice %3 {offsets = [0, 240], sizes = [4, 16], strides = [1, 1]} : vector<4x256xf32> to vector<4x16xf32>
    %17 = vector.extract_strided_slice %3 {offsets = [0, 0], sizes = [4, 240], strides = [1, 1]} : vector<4x256xf32> to vector<4x240xf32>
    %18 = tpu.concatenate %16, %17 in 1 : vector<4x16xf32>, vector<4x240xf32> -> vector<4x256xf32>
    %c1_i32_6 = arith.constant 1 : i32
    %19 = vector.broadcast %c1_i32_6 : i32 to vector<1x256xi32>
    %20 = arith.cmpi sge, %1, %19 : vector<1x256xi32>
    %cst_7 = arith.constant 0.000000e+00 : f32
    %21 = vector.shape_cast %20 : vector<1x256xi1> to vector<1x256xi1>
    %22 = vector.broadcast %21 : vector<1x256xi1> to vector<4x256xi1>
    %23 = vector.broadcast %cst_7 : f32 to vector<4x256xf32>
    %24 = arith.select %22, %18, %23 : vector<4x256xi1>, vector<4x256xf32>
    %25 = vector.extract_strided_slice %3 {offsets = [0, 241], sizes = [4, 15], strides = [1, 1]} : vector<4x256xf32> to vector<4x15xf32>
    %26 = vector.extract_strided_slice %3 {offsets = [0, 0], sizes = [4, 241], strides = [1, 1]} : vector<4x256xf32> to vector<4x241xf32>
    %27 = tpu.concatenate %25, %26 in 1 : vector<4x15xf32>, vector<4x241xf32> -> vector<4x256xf32>
    %c1_i32_8 = arith.constant 1 : i32
    %28 = vector.broadcast %c1_i32_8 : i32 to vector<1x256xi32>
    %29 = arith.cmpi sge, %1, %28 : vector<1x256xi32>
    %c14_i32 = arith.constant 14 : i32
    %30 = vector.broadcast %c14_i32 : i32 to vector<1x256xi32>
    %31 = arith.cmpi sle, %0, %30 : vector<1x256xi32>
    %32 = arith.andi %29, %31 : vector<1x256xi1>
    %cst_9 = arith.constant 0.000000e+00 : f32
    %33 = vector.shape_cast %32 : vector<1x256xi1> to vector<1x256xi1>
    %34 = vector.broadcast %33 : vector<1x256xi1> to vector<4x256xi1>
    %35 = vector.broadcast %cst_9 : f32 to vector<4x256xf32>
    %36 = arith.select %34, %27, %35 : vector<4x256xi1>, vector<4x256xf32>
    %37 = vector.extract_strided_slice %3 {offsets = [0, 255], sizes = [4, 1], strides = [1, 1]} : vector<4x256xf32> to vector<4x1xf32>
    %38 = vector.extract_strided_slice %3 {offsets = [0, 0], sizes = [4, 255], strides = [1, 1]} : vector<4x256xf32> to vector<4x255xf32>
    %39 = tpu.concatenate %37, %38 in 1 : vector<4x1xf32>, vector<4x255xf32> -> vector<4x256xf32>
    %c1_i32_10 = arith.constant 1 : i32
    %40 = vector.broadcast %c1_i32_10 : i32 to vector<1x256xi32>
    %41 = arith.cmpi sge, %0, %40 : vector<1x256xi32>
    %cst_11 = arith.constant 0.000000e+00 : f32
    %42 = vector.shape_cast %41 : vector<1x256xi1> to vector<1x256xi1>
    %43 = vector.broadcast %42 : vector<1x256xi1> to vector<4x256xi1>
    %44 = vector.broadcast %cst_11 : f32 to vector<4x256xf32>
    %45 = arith.select %43, %39, %44 : vector<4x256xi1>, vector<4x256xf32>
    %46 = vector.extract_strided_slice %3 {offsets = [0, 1], sizes = [4, 255], strides = [1, 1]} : vector<4x256xf32> to vector<4x255xf32>
    %47 = vector.extract_strided_slice %3 {offsets = [0, 0], sizes = [4, 1], strides = [1, 1]} : vector<4x256xf32> to vector<4x1xf32>
    %48 = tpu.concatenate %46, %47 in 1 : vector<4x255xf32>, vector<4x1xf32> -> vector<4x256xf32>
    %c14_i32_12 = arith.constant 14 : i32
    %49 = vector.broadcast %c14_i32_12 : i32 to vector<1x256xi32>
    %50 = arith.cmpi sle, %0, %49 : vector<1x256xi32>
    %cst_13 = arith.constant 0.000000e+00 : f32
    %51 = vector.shape_cast %50 : vector<1x256xi1> to vector<1x256xi1>
    %52 = vector.broadcast %51 : vector<1x256xi1> to vector<4x256xi1>
    %53 = vector.broadcast %cst_13 : f32 to vector<4x256xf32>
    %54 = arith.select %52, %48, %53 : vector<4x256xi1>, vector<4x256xf32>
    %55 = vector.extract_strided_slice %3 {offsets = [0, 15], sizes = [4, 241], strides = [1, 1]} : vector<4x256xf32> to vector<4x241xf32>
    %56 = vector.extract_strided_slice %3 {offsets = [0, 0], sizes = [4, 15], strides = [1, 1]} : vector<4x256xf32> to vector<4x15xf32>
    %57 = tpu.concatenate %55, %56 in 1 : vector<4x241xf32>, vector<4x15xf32> -> vector<4x256xf32>
    %c14_i32_14 = arith.constant 14 : i32
    %58 = vector.broadcast %c14_i32_14 : i32 to vector<1x256xi32>
    %59 = arith.cmpi sle, %1, %58 : vector<1x256xi32>
    %c1_i32_15 = arith.constant 1 : i32
    %60 = vector.broadcast %c1_i32_15 : i32 to vector<1x256xi32>
    %61 = arith.cmpi sge, %0, %60 : vector<1x256xi32>
    %62 = arith.andi %59, %61 : vector<1x256xi1>
    %cst_16 = arith.constant 0.000000e+00 : f32
    %63 = vector.shape_cast %62 : vector<1x256xi1> to vector<1x256xi1>
    %64 = vector.broadcast %63 : vector<1x256xi1> to vector<4x256xi1>
    %65 = vector.broadcast %cst_16 : f32 to vector<4x256xf32>
    %66 = arith.select %64, %57, %65 : vector<4x256xi1>, vector<4x256xf32>
    %67 = vector.extract_strided_slice %3 {offsets = [0, 16], sizes = [4, 240], strides = [1, 1]} : vector<4x256xf32> to vector<4x240xf32>
    %68 = vector.extract_strided_slice %3 {offsets = [0, 0], sizes = [4, 16], strides = [1, 1]} : vector<4x256xf32> to vector<4x16xf32>
    %69 = tpu.concatenate %67, %68 in 1 : vector<4x240xf32>, vector<4x16xf32> -> vector<4x256xf32>
    %c14_i32_17 = arith.constant 14 : i32
    %70 = vector.broadcast %c14_i32_17 : i32 to vector<1x256xi32>
    %71 = arith.cmpi sle, %1, %70 : vector<1x256xi32>
    %cst_18 = arith.constant 0.000000e+00 : f32
    %72 = vector.shape_cast %71 : vector<1x256xi1> to vector<1x256xi1>
    %73 = vector.broadcast %72 : vector<1x256xi1> to vector<4x256xi1>
    %74 = vector.broadcast %cst_18 : f32 to vector<4x256xf32>
    %75 = arith.select %73, %69, %74 : vector<4x256xi1>, vector<4x256xf32>
    %76 = vector.extract_strided_slice %3 {offsets = [0, 17], sizes = [4, 239], strides = [1, 1]} : vector<4x256xf32> to vector<4x239xf32>
    %77 = vector.extract_strided_slice %3 {offsets = [0, 0], sizes = [4, 17], strides = [1, 1]} : vector<4x256xf32> to vector<4x17xf32>
    %78 = tpu.concatenate %76, %77 in 1 : vector<4x239xf32>, vector<4x17xf32> -> vector<4x256xf32>
    %c14_i32_19 = arith.constant 14 : i32
    %79 = vector.broadcast %c14_i32_19 : i32 to vector<1x256xi32>
    %80 = arith.cmpi sle, %1, %79 : vector<1x256xi32>
    %c14_i32_20 = arith.constant 14 : i32
    %81 = vector.broadcast %c14_i32_20 : i32 to vector<1x256xi32>
    %82 = arith.cmpi sle, %0, %81 : vector<1x256xi32>
    %83 = arith.andi %80, %82 : vector<1x256xi1>
    %cst_21 = arith.constant 0.000000e+00 : f32
    %84 = vector.shape_cast %83 : vector<1x256xi1> to vector<1x256xi1>
    %85 = vector.broadcast %84 : vector<1x256xi1> to vector<4x256xi1>
    %86 = vector.broadcast %cst_21 : f32 to vector<4x256xf32>
    %87 = arith.select %85, %78, %86 : vector<4x256xi1>, vector<4x256xf32>
    %cst_22 = arith.constant -0.707106769 : f32
    %88 = vector.broadcast %cst_22 : f32 to vector<4x256xf32>
    %89 = arith.mulf %45, %88 : vector<4x256xf32>
    %cst_23 = arith.constant 0.707106769 : f32
    %90 = vector.broadcast %cst_23 : f32 to vector<4x256xf32>
    %91 = arith.mulf %54, %90 : vector<4x256xf32>
    %92 = arith.addf %89, %91 : vector<4x256xf32>
    %cst_24 = arith.constant 0.707106769 : f32
    %93 = vector.broadcast %cst_24 : f32 to vector<4x256xf32>
    %94 = arith.mulf %24, %93 : vector<4x256xf32>
    %cst_25 = arith.constant -0.707106769 : f32
    %95 = vector.broadcast %cst_25 : f32 to vector<4x256xf32>
    %96 = arith.mulf %75, %95 : vector<4x256xf32>
    %97 = arith.addf %94, %96 : vector<4x256xf32>
    %cst_26 = arith.constant 0.408248305 : f32
    %98 = vector.broadcast %cst_26 : f32 to vector<4x256xf32>
    %99 = arith.mulf %45, %98 : vector<4x256xf32>
    %cst_27 = arith.constant -0.816496611 : f32
    %100 = vector.broadcast %cst_27 : f32 to vector<4x256xf32>
    %101 = arith.mulf %3, %100 : vector<4x256xf32>
    %102 = arith.addf %99, %101 : vector<4x256xf32>
    %cst_28 = arith.constant 0.408248305 : f32
    %103 = vector.broadcast %cst_28 : f32 to vector<4x256xf32>
    %104 = arith.mulf %54, %103 : vector<4x256xf32>
    %105 = arith.addf %102, %104 : vector<4x256xf32>
    %cst_29 = arith.constant 0.408248305 : f32
    %106 = vector.broadcast %cst_29 : f32 to vector<4x256xf32>
    %107 = arith.mulf %24, %106 : vector<4x256xf32>
    %cst_30 = arith.constant -0.816496611 : f32
    %108 = vector.broadcast %cst_30 : f32 to vector<4x256xf32>
    %109 = arith.mulf %3, %108 : vector<4x256xf32>
    %110 = arith.addf %107, %109 : vector<4x256xf32>
    %cst_31 = arith.constant 0.408248305 : f32
    %111 = vector.broadcast %cst_31 : f32 to vector<4x256xf32>
    %112 = arith.mulf %75, %111 : vector<4x256xf32>
    %113 = arith.addf %110, %112 : vector<4x256xf32>
    %cst_32 = arith.constant -5.000000e-01 : f32
    %114 = vector.broadcast %cst_32 : f32 to vector<4x256xf32>
    %115 = arith.mulf %15, %114 : vector<4x256xf32>
    %cst_33 = arith.constant 5.000000e-01 : f32
    %116 = vector.broadcast %cst_33 : f32 to vector<4x256xf32>
    %117 = arith.mulf %36, %116 : vector<4x256xf32>
    %118 = arith.addf %115, %117 : vector<4x256xf32>
    %cst_34 = arith.constant 5.000000e-01 : f32
    %119 = vector.broadcast %cst_34 : f32 to vector<4x256xf32>
    %120 = arith.mulf %66, %119 : vector<4x256xf32>
    %121 = arith.addf %118, %120 : vector<4x256xf32>
    %cst_35 = arith.constant -5.000000e-01 : f32
    %122 = vector.broadcast %cst_35 : f32 to vector<4x256xf32>
    %123 = arith.mulf %87, %122 : vector<4x256xf32>
    %124 = arith.addf %121, %123 : vector<4x256xf32>
    %cst_36 = arith.constant 0.288675129 : f32
    %125 = vector.broadcast %cst_36 : f32 to vector<4x256xf32>
    %126 = arith.mulf %15, %125 : vector<4x256xf32>
    %cst_37 = arith.constant -0.577350259 : f32
    %127 = vector.broadcast %cst_37 : f32 to vector<4x256xf32>
    %128 = arith.mulf %24, %127 : vector<4x256xf32>
    %129 = arith.addf %126, %128 : vector<4x256xf32>
    %cst_38 = arith.constant 0.288675129 : f32
    %130 = vector.broadcast %cst_38 : f32 to vector<4x256xf32>
    %131 = arith.mulf %36, %130 : vector<4x256xf32>
    %132 = arith.addf %129, %131 : vector<4x256xf32>
    %cst_39 = arith.constant -0.288675129 : f32
    %133 = vector.broadcast %cst_39 : f32 to vector<4x256xf32>
    %134 = arith.mulf %66, %133 : vector<4x256xf32>
    %135 = arith.addf %132, %134 : vector<4x256xf32>
    %cst_40 = arith.constant 0.577350259 : f32
    %136 = vector.broadcast %cst_40 : f32 to vector<4x256xf32>
    %137 = arith.mulf %75, %136 : vector<4x256xf32>
    %138 = arith.addf %135, %137 : vector<4x256xf32>
    %cst_41 = arith.constant -0.288675129 : f32
    %139 = vector.broadcast %cst_41 : f32 to vector<4x256xf32>
    %140 = arith.mulf %87, %139 : vector<4x256xf32>
    %141 = arith.addf %138, %140 : vector<4x256xf32>
    %cst_42 = arith.constant -0.288675129 : f32
    %142 = vector.broadcast %cst_42 : f32 to vector<4x256xf32>
    %143 = arith.mulf %15, %142 : vector<4x256xf32>
    %cst_43 = arith.constant 0.288675129 : f32
    %144 = vector.broadcast %cst_43 : f32 to vector<4x256xf32>
    %145 = arith.mulf %36, %144 : vector<4x256xf32>
    %146 = arith.addf %143, %145 : vector<4x256xf32>
    %cst_44 = arith.constant 0.577350259 : f32
    %147 = vector.broadcast %cst_44 : f32 to vector<4x256xf32>
    %148 = arith.mulf %45, %147 : vector<4x256xf32>
    %149 = arith.addf %146, %148 : vector<4x256xf32>
    %cst_45 = arith.constant -0.577350259 : f32
    %150 = vector.broadcast %cst_45 : f32 to vector<4x256xf32>
    %151 = arith.mulf %54, %150 : vector<4x256xf32>
    %152 = arith.addf %149, %151 : vector<4x256xf32>
    %cst_46 = arith.constant -0.288675129 : f32
    %153 = vector.broadcast %cst_46 : f32 to vector<4x256xf32>
    %154 = arith.mulf %66, %153 : vector<4x256xf32>
    %155 = arith.addf %152, %154 : vector<4x256xf32>
    %cst_47 = arith.constant 0.288675129 : f32
    %156 = vector.broadcast %cst_47 : f32 to vector<4x256xf32>
    %157 = arith.mulf %87, %156 : vector<4x256xf32>
    %158 = arith.addf %155, %157 : vector<4x256xf32>
    %cst_48 = arith.constant 0.166666672 : f32
    %159 = vector.broadcast %cst_48 : f32 to vector<4x256xf32>
    %160 = arith.mulf %15, %159 : vector<4x256xf32>
    %cst_49 = arith.constant -0.333333343 : f32
    %161 = vector.broadcast %cst_49 : f32 to vector<4x256xf32>
    %162 = arith.mulf %24, %161 : vector<4x256xf32>
    %163 = arith.addf %160, %162 : vector<4x256xf32>
    %cst_50 = arith.constant 0.166666672 : f32
    %164 = vector.broadcast %cst_50 : f32 to vector<4x256xf32>
    %165 = arith.mulf %36, %164 : vector<4x256xf32>
    %166 = arith.addf %163, %165 : vector<4x256xf32>
    %cst_51 = arith.constant -0.333333343 : f32
    %167 = vector.broadcast %cst_51 : f32 to vector<4x256xf32>
    %168 = arith.mulf %45, %167 : vector<4x256xf32>
    %169 = arith.addf %166, %168 : vector<4x256xf32>
    %cst_52 = arith.constant 0.666666686 : f32
    %170 = vector.broadcast %cst_52 : f32 to vector<4x256xf32>
    %171 = arith.mulf %3, %170 : vector<4x256xf32>
    %172 = arith.addf %169, %171 : vector<4x256xf32>
    %cst_53 = arith.constant -0.333333343 : f32
    %173 = vector.broadcast %cst_53 : f32 to vector<4x256xf32>
    %174 = arith.mulf %54, %173 : vector<4x256xf32>
    %175 = arith.addf %172, %174 : vector<4x256xf32>
    %cst_54 = arith.constant 0.166666672 : f32
    %176 = vector.broadcast %cst_54 : f32 to vector<4x256xf32>
    %177 = arith.mulf %66, %176 : vector<4x256xf32>
    %178 = arith.addf %175, %177 : vector<4x256xf32>
    %cst_55 = arith.constant -0.333333343 : f32
    %179 = vector.broadcast %cst_55 : f32 to vector<4x256xf32>
    %180 = arith.mulf %75, %179 : vector<4x256xf32>
    %181 = arith.addf %178, %180 : vector<4x256xf32>
    %cst_56 = arith.constant 0.166666672 : f32
    %182 = vector.broadcast %cst_56 : f32 to vector<4x256xf32>
    %183 = arith.mulf %87, %182 : vector<4x256xf32>
    %184 = arith.addf %181, %183 : vector<4x256xf32>
    %185 = tpu.concatenate %3, %92, %97, %105, %113, %124, %141, %158, %184 in 0 : vector<4x256xf32>, vector<4x256xf32>, vector<4x256xf32>, vector<4x256xf32>, vector<4x256xf32>, vector<4x256xf32>, vector<4x256xf32>, vector<4x256xf32>, vector<4x256xf32> -> vector<36x256xf32>
    %186 = vector.shape_cast %185 : vector<36x256xf32> to vector<1x36x256xf32>
    %cst_57 = arith.constant dense<0.000000e+00> : vector<1xf32>
    %187 = vector.multi_reduction <add>, %186, %cst_57 [1, 2] : vector<1x36x256xf32> to vector<1xf32>
    %188 = vector.shape_cast %187 : vector<1xf32> to vector<1x1x1xf32>
    %189 = vector.extract %188[0, 0, 0] : f32 from vector<1x1x1xf32>
    %cst_58 = arith.constant 9.216000e+03 : f32
    %190 = arith.divf %189, %cst_58 : f32
    %191 = vector.broadcast %190 : f32 to vector<36x256xf32>
    %192 = arith.subf %185, %191 : vector<36x256xf32>
    %193 = arith.mulf %192, %192 : vector<36x256xf32>
    %194 = vector.shape_cast %193 : vector<36x256xf32> to vector<1x36x256xf32>
    %cst_59 = arith.constant dense<0.000000e+00> : vector<1xf32>
    %195 = vector.multi_reduction <add>, %194, %cst_59 [1, 2] : vector<1x36x256xf32> to vector<1xf32>
    %196 = vector.shape_cast %195 : vector<1xf32> to vector<1x1x1xf32>
    %197 = vector.extract %196[0, 0, 0] : f32 from vector<1x1x1xf32>
    %cst_60 = arith.constant 9.216000e+03 : f32
    %198 = arith.divf %197, %cst_60 : f32
    %cst_61 = arith.constant 9.99999974E-6 : f32
    %199 = arith.addf %198, %cst_61 : f32
    %200 = math.rsqrt %199 : f32
    %201 = vector.broadcast %200 : f32 to vector<36x256xf32>
    %202 = arith.mulf %192, %201 : vector<36x256xf32>
    %c0_62 = arith.constant 0 : index
    %c0_63 = arith.constant 0 : index
    %203 = vector.load %arg3[%c0_62, %c0_63] : memref<8x36xf32, #tpu.memory_space<vmem>>, vector<8x36xf32>
    %cst_64 = arith.constant dense<0.000000e+00> : vector<8x256xf32>
    %204 = tpu.matmul %203, %202, %cst_64 {dimension_numbers = #tpu.dot_dimension_numbers<[1], [0], [0], [1], [0, 0, 1, 1], [], []>} : vector<8x36xf32>, vector<36x256xf32>, vector<8x256xf32> -> vector<8x256xf32>
    %c0_65 = arith.constant 0 : index
    %c0_66 = arith.constant 0 : index
    %205 = vector.load %arg4[%c0_65, %c0_66] : memref<8x1xf32, #tpu.memory_space<vmem>>, vector<8x1xf32>
    %206 = vector.broadcast %205 : vector<8x1xf32> to vector<8x256xf32>
    %207 = arith.addf %204, %206 : vector<8x256xf32>
    %c0_67 = arith.constant 0 : index
    %c0_68 = arith.constant 0 : index
    %c0_69 = arith.constant 0 : index
    %208 = vector.load %arg5[%c0_67, %c0_68, %c0_69] : memref<1x8x256xf32, #tpu.memory_space<vmem>>, vector<1x8x256xf32>
    %209 = vector.shape_cast %208 : vector<1x8x256xf32> to vector<8x256xf32>
    %210 = vector.shape_cast %207 : vector<8x256xf32> to vector<1x8x256xf32>
    tpu.vector_store %arg5[%c0_67, %c0_68, %c0_69], %210 {strides = array<i32>} : memref<1x8x256xf32, #tpu.memory_space<vmem>>, vector<1x8x256xf32>,
    return
  }
  func.func @transform_0(%arg0: i32) -> (i32, i32, i32) {
    %c0_i32 = arith.constant 0 : i32
    %c0_i32_0 = arith.constant 0 : i32
    %c0_i32_1 = arith.constant 0 : i32
    return %arg0, %c0_i32, %c0_i32_0 : i32, i32, i32
  }
  func.func @transform_1(%arg0: i32) -> (i32, i32) {
    %c0_i32 = arith.constant 0 : i32
    %c0_i32_0 = arith.constant 0 : i32
    %c0_i32_1 = arith.constant 0 : i32
    return %c0_i32, %c0_i32_0 : i32, i32
  }
  func.func @transform_2(%arg0: i32) -> (i32, i32) {
    %c0_i32 = arith.constant 0 : i32
    %c0_i32_0 = arith.constant 0 : i32
    %c0_i32_1 = arith.constant 0 : i32
    return %c0_i32, %c0_i32_0 : i32, i32
  }
  func.func @transform_3(%arg0: i32) -> (i32, i32) {
    %c0_i32 = arith.constant 0 : i32
    %c0_i32_0 = arith.constant 0 : i32
    %c0_i32_1 = arith.constant 0 : i32
    return %c0_i32, %c0_i32_0 : i32, i32
  }
  func.func @transform_4(%arg0: i32) -> (i32, i32, i32) {
    %c0_i32 = arith.constant 0 : i32
    %c0_i32_0 = arith.constant 0 : i32
    %c0_i32_1 = arith.constant 0 : i32
    return %arg0, %c0_i32, %c0_i32_0 : i32, i32, i32
  }
}

</mosaic_0001>

<bundles_post_ra>
// kernel: tpu_custom_call.1
= control target key start
LH: loop header
LB: loop body
LE: loop exit
PB: predicated region body
PF: predicated region fallthrough
CT: control target
= control target key end

     0   :  { %9 = vsyncpa [#allocation3], 0  ;;  %s1499_s0 = inlined_call_operand.hbm [shape: f32[2,4,256], index: 0, kind: input, shape index: {}]   ;;  %s1500_s1 = inlined_call_operand.hbm [shape: s32[2,256], index: 1, kind: input, shape index: {}]   ;;  %s1501_s2 = inlined_call_operand.vmem [shape: f32[8,36], index: 2, kind: input, shape index: {}]   ;;  %s1502_s3 = inlined_call_operand.vmem [shape: f32[8,1], index: 3, kind: input, shape index: {}]   ;;  %s1503_s4 = inlined_call_operand.hbm [shape: f32[2,8,256], index: 4, kind: output, shape index: {}]  }
   0x1   :  { %11 = vsyncpa [#allocation3 + $0x1], 0 }
   0x2   :  { %12 = vsyncpa [#allocation6], 0 }
   0x3   :  { %13 = vsyncpa [#allocation4], 0 }
   0x4   :  { %15 = vsyncpa [#allocation4 + $0x1], 0  ;;  %s1137_s15 = smov 0   ;;  %s1139_s16 = smov 0  }
   0x5   :  { %s1141_s17 = smov 0   ;;  %s1143_s18 = smov 0  }
   0x6 LB: > { %s1158_s19 = sadd.s32 4294967295, %s1099_s18   ;;  %s866_s20 = sadd.s32 4294967294, %s1099_s18   ;;  %s1099_s18 = sphi %s1143_s18, %s1525_s18   ;;  %s1095_s17 = sphi %s1141_s17, %s1524_s17   ;;  %s1091_s16 = sphi %s1139_s16, %s1523_s16   ;;  %s1087_s15 = sphi %s1137_s15, %s1522_s15  }
   0x7   : > { %p41_p0 = scmp.ne.s32.totalorder %s1091_s16, %s1087_s15  ;;  %p42_p1 = scmp.eq.s32.totalorder %s1158_s19, 0 }
   0x8   : > { %p128_p2 = scmp.eq.s32.totalorder %s1158_s19, 1  ;;  %p134_p3 = scmp.eq.s32.totalorder %s866_s20, 1 }
   0x9   : > { %p1167_p4 = por %p42_p1, %p41_p0  ;;  %p867_p5 = scmp.ge.s32.totalorder %s1099_s18, 1 }
   0xa   : > { %p1172_p6 = por %p134_p3, %p41_p0  ;;  %p141_p7 = scmp.lt.s32.totalorder %s1099_s18, 3 }
   0xb   : > { %s153_s25 = sshll.u32 %s1500_s1, 4  ;;  %s1101_s27 = smov [#allocation5]   ;;  %s154_s25 = int_to_ptr.hbm [resolvable:$true] %s153_s25 }
   0xc   : > { %p1180_p8 = pnand %p867_p5, %p141_p7  ;;  %s155_s28 = sshll.u32 %s1101_s27, 4  ;;  %s156_s28 = int_to_ptr.vmem [resolvable:$true] %s155_s28 }
   0xd   : > { %s1190_s29 = sadd.s32 1, %s1099_s18   ;;  %s28_s30 = sadd.s32 1, %s1095_s17 }
   0xe   : > { %p904_p10 = pneg %p1180_p8  ;;  %s25_s5 = ssub.s32 %s1099_s18, %s1190_s29 }
   0xf   : > { %p26_p12 = scmp.eq.s32.totalorder %s25_s5, 0  ;;  %p35_p13 = scmp.ne.s32.totalorder %s1095_s17, %s1091_s16 }
  0x10   : > { %p905_p11 = pnand %p904_p10, %p42_p1  ;;  %p36_p0 = scmp.eq.s32.totalorder %s1099_s18, 0 }
  0x11   : > { %s1199_s6 = scalar_select %p26_p12, %s1095_s17, %s28_s30  }
  0x12   : > { %907 = dma.hbm_to_vmem [thread:$0]  (!%p905_p11), %s154_s25, 64, %s156_s28, [#allocation6]  }
  0x13   : > { %p1203_p3 = por %p128_p2, %p35_p13  ;;  %p917_p5 = scmp.lt.s32.totalorder %s1099_s18, 2 }
  0x14   : > { %s172_s8 = sand.u32 1, %s1095_s17   ;;  %s886_s9 = sshll.u32 %s1099_s18, 3 }
  0x15   : > { %p37_p7 = por %p36_p0, %p35_p13  ;;  %s870_s10 = sshll.u32 %s172_s8, 3 }
  0x16   : > { %s181_s13 = scalar_lea.hbm %s1499_s0, %s886_s9  ;;  %s176_s20 = scalar_lea.vmem [#allocation2], %s870_s10 }
  0x17   : > { %s183_s14 = sshll.u32 %s181_s13, 4  ;;  %s185_s23 = sshll.u32 %s176_s20, 4  ;;  %s184_s14 = int_to_ptr.hbm [resolvable:$true] %s183_s14  ;;  %s186_s23 = int_to_ptr.vmem [resolvable:$true] %s185_s23 }
  0x18   : > { %p1213_p10 = pnand %p917_p5, %p37_p7  ;;  %s173_s25 = scalar_lea.sflag [#allocation3], %s172_s8 }
  0x19   : > { %s999_s27 = sshra.s32 %s184_s14, 4  ;;  %s1006_s9 = scalar_lea.hbm %s1499_s0, 16  ;;  %s1000_s27 = int_to_ptr.hbm [resolvable:$true] %s999_s27 }
  0x1a   : > { %s1001_s28 = scalar_lea.hbm %s1000_s27, 8  ;;  %p1003_p11 = pneg %p1213_p10 }
  0x1b   : > { %p1002_p2 = scmp.ne.s32.totalorder %s1000_s27, %s1001_s28  ;;  %p1007_p0 = scmp.lt.s32.totalorder %s1000_s27, %s1499_s0 }
  0x1c   : > { %p1008_p5 = scmp.lt.s32.totalorder %s1006_s9, %s1001_s28 }
  0x1d   : > { %p1004_p12 = pnand %p1003_p11, %p1002_p2 }
  0x1e   : > { %p1009_p7 = por %p1008_p5, %p1007_p0 }
  0x1f   : > { %p1005_p13 = pneg %p1004_p12 }
  0x21   : > { %p1010_p9 = pnand %p1009_p7, %p1005_p13 }
  0x23   : > { %1013 = shalt.err (!%p1010_p9)
}
  0x24   : > { %911 = dma.hbm_to_vmem [thread:$0]  (!%p1213_p10), %s184_s14, 128, %s186_s23, %s173_s25  }
  0x25   : > { %194 = sbr.rel (%p1180_p8) target bundleno = 901 (0x385), region = 36  ;;  %s1230_s8 = sand.u32 (!%p1180_p8), 1, %s1091_s16  }
  0x26   : > { %s874_s12 = sshll.u32 (!%p1180_p8), %s1230_s8, 3  ;;  %s197_s13 = scalar_lea.sflag (!%p1180_p8), [#allocation3], %s1230_s8 }
  0x27   : > { %s200_s20 = scalar_lea.vmem (!%p1180_p8), [#allocation2], %s874_s12 }
  0x2a   : > { %1074 = dma.done.wait (%p1167_p4), %s197_s13, 128  }
  0x2b   : > { %1076 = vsyncadd (%p1167_p4), %s197_s13, 4294967168 }
  0x2c   : > { %1078 = dma.done.wait (%p42_p1), [#allocation6], 64  }
  0x2d   : > { %1080 = vsyncadd (%p42_p1), [#allocation6], 4294967232  ;;  %v1242_v0 = vld [vmem:[%s200_s20] sm:$0xff]  ;;  %s1102_s26 = smov 17   ;;  %s1103_s21 = smov 16   ;;  %v1108_v19 = vmov 0  }
  0x2e   : > { %236 = vst [vmem:[#allocation1] ss:$2 sm:$0xff] %v1242_v0  ;;  %s1104_s14 = smov 15   ;;  %s1105_s23 = smov 1   ;;  %963 = vset.pattern.permute.xlu2 %v1108_v19  ;;  %964 = vset.pattern.permute.xlu0 %v1108_v19  ;;  %v450_v25 = vmul.f32 -0.8164966, %v1242_v0 }
  0x2f   : > { %s1106_s24 = smov 127   ;;  %s1107_s25 = smov 113   ;;  %v544_v29 = vmul.f32 0.6666667, %v1242_v0  ;;  %vm248_vm5 = vcmask 138240   ;;  %vm275_vm7 = vcmask 130048  }
  0x30   : > { %s1109_s27 = smov 112   ;;  %s1110_s28 = smov 111   ;;  %v1277_v40 = vld [vmem:[#allocation5] ss:$2 sm:$0x3]  ;;  %vm299_vm11 = vcmask 121856  }
  0x31   : > { %v1279_v41 = vld [vmem:[#allocation5 + $0x1] ss:$2 sm:$0x3]  ;;  %vm254_vm1 = vcmp.ge.s32.totalorder %v1277_v40, 1  ;;  %vm304_vm3 = vcmp.le.s32.totalorder %v1277_v40, 14  ;;  %vm325_vm14 = vcmask 7168  }
  0x32   : > { %vm253_vm0 = vcmp.ge.s32.totalorder %v1279_v41, 1  ;;  %vm344_vm15 = vcmask 1039360   ;;  %s1049_s20 = scalar_lea.hbm %s1503_s4, 32 }
  0x33   : > { %vm255_vm2 = vmand %vm253_vm0, %vm254_vm1  ;;  %v280_v47 = vsel %vm253_vm0, 1, %v1108_v19 }
  0x34   : > { %v256_v45 = vsel %vm255_vm2, 1, %v1108_v19  ;;  %vm305_vm4 = vmand %vm253_vm0, %vm304_vm3  ;;  %v281_v49 = vperm.slane %v280_v47, 0  ;;  %v282_v53 = vperm.slane %v280_v47, 1  ;;  %vm378_vm0 = vcmp.le.s32.totalorder %v1279_v41, 14 }
  0x35   : > { %v237_v1 = vld.sshfl [vmem:[#allocation1 + $0x8] sm:$0xff pattern:$0x75316420]  ;;  %v257_v46 = vperm.slane %v256_v45, 0  ;;  %v258_v48 = vperm.slane %v256_v45, 1  ;;  %v306_v50 = vsel %vm305_vm4, 1, %v1108_v19 }
  0x36   : > { %238 = vrot.lane.b32.xlu0 %v237_v1, %s1102_s26  ;;  %241 = vst [vmem:[#allocation1] ss:$2 sm:$0xff] %v1242_v0  ;;  %v308_v56 = vperm.slane %v306_v50, 1  ;;  %v307_v57 = vperm.slane %v306_v50, 0  ;;  %vm283_vm9 = vcmp.eq.s32.totalorder %v281_v49, 1  ;;  %vm284_vm10 = vcmp.eq.s32.totalorder %v282_v53, 1 }
  0x37   : > { %vm259_vm6 = vcmp.eq.s32.totalorder %v257_v46, 1  ;;  %vm260_vm8 = vcmp.eq.s32.totalorder %v258_v48, 1 }
  0x38   : > { %vm1297_vm12 = vcmp.eq.s32.totalorder %v308_v56, 1  ;;  %vm1301_vm13 = vcmp.eq.s32.totalorder %v307_v57, 1 }
  0x3d   : > { %v242_v2 = vld.sshfl [vmem:[#allocation1] sm:$0xff pattern:$0x75316420]  ;;  %v243_v3 = vld.sshfl [vmem:[#allocation1 + $0x8] sm:$0xff pattern:$0x75316420] }
  0x3e   : > { %244 = vrot.lane.b32.xlu1 %v242_v2, %s1102_s26  ;;  %246 = vrot.lane.b32.xlu0 %v243_v3, %s1102_s26  ;;  %263 = vst [vmem:[#allocation1] ss:$2 sm:$0xff] %v1242_v0 }
  0x45   : > { %v264_v4 = vld.sshfl [vmem:[#allocation1 + $0x8] sm:$0xff pattern:$0x75316420] }
  0x46   : > { %268 = vst [vmem:[#allocation1] ss:$2 sm:$0xff] %v1242_v0  ;;  %265 = vrot.lane.b32.xlu2 %v264_v4, %s1103_s21 }
  0x4d   : > { %v270_v5 = vld.sshfl [vmem:[#allocation1 + $0x8] sm:$0xff pattern:$0x75316420]  ;;  %v269_v6 = vld.sshfl [vmem:[#allocation1] sm:$0xff pattern:$0x75316420] }
  0x4e   : > { %273 = vrot.lane.b32.xlu1 %v270_v5, %s1103_s21  ;;  %271 = vrot.lane.b32.xlu0 %v269_v6, %s1103_s21  ;;  %287 = vst [vmem:[#allocation1] ss:$2 sm:$0xff] %v1242_v0 }
  0x55   : > { %v288_v7 = vld.sshfl [vmem:[#allocation1 + $0x8] sm:$0xff pattern:$0x75316420] }
  0x56   : > { %289 = vrot.lane.b32.xlu1 %v288_v7, %s1104_s14  ;;  %292 = vst [vmem:[#allocation1] ss:$2 sm:$0xff] %v1242_v0 }
  0x5d   : > { %v293_v8 = vld.sshfl [vmem:[#allocation1] sm:$0xff pattern:$0x75316420]  ;;  %v294_v9 = vld.sshfl [vmem:[#allocation1 + $0x8] sm:$0xff pattern:$0x75316420] }
  0x5e   : > { %313 = vst [vmem:[#allocation1] ss:$2 sm:$0xff] %v1242_v0  ;;  %295 = vrot.lane.b32.xlu2 %v293_v8, %s1104_s14 }
  0x65   : > { %v314_v10 = vld.sshfl [vmem:[#allocation1 + $0x8] sm:$0xff pattern:$0x75316420] }
  0x66   : > { %315 = vrot.lane.b32.xlu0 %v314_v10, %s1105_s23  ;;  %318 = vst [vmem:[#allocation1] ss:$2 sm:$0xff] %v1242_v0  ;;  %297 = vrot.lane.b32.xlu2 %v294_v9, %s1104_s14 }
  0x6d   : > { %v320_v11 = vld.sshfl [vmem:[#allocation1 + $0x8] sm:$0xff pattern:$0x75316420]  ;;  %v319_v12 = vld.sshfl [vmem:[#allocation1] sm:$0xff pattern:$0x75316420] }
  0x6e   : > { %323 = vrot.lane.b32.xlu1 %v320_v11, %s1105_s23  ;;  %321 = vrot.lane.b32.xlu0 %v319_v12, %s1105_s23  ;;  %337 = vst [vmem:[#allocation1] ss:$2 sm:$0xff] %v1242_v0  ;;  %s876_s23 = sshll.u32 %s1230_s8, 4 }
  0x75   : > { %v338_v13 = vld.sshfl [vmem:[#allocation1] sm:$0xff pattern:$0x75316420]  ;;  %v339_v14 = vld.sshfl [vmem:[#allocation1 + $0x8] sm:$0xff pattern:$0x75316420] }
  0x76   : > { %340 = vrot.lane.b32.xlu1 %v338_v13, %s1106_s24  ;;  %342 = vrot.lane.b32.xlu2 %v339_v14, %s1106_s24  ;;  %348 = vst [vmem:[#allocation1] ss:$2 sm:$0xff] %v1242_v0  ;;  %v330_v14 = vsel %vm254_vm1, 1, %v1108_v19 }
  0x7d   : > { %v349_v15 = vld.sshfl [vmem:[#allocation1] sm:$0xff pattern:$0x75316420] }
  0x7e   : > { %361 = vst [vmem:[#allocation1] ss:$2 sm:$0xff] %v1242_v0  ;;  %350 = vrot.lane.b32.xlu2 %v349_v15, %s1106_s24  ;;  %s887_s24 = sshll.u32 %s1158_s19, 4 }
  0x85   : > { %v363_v16 = vld.sshfl [vmem:[#allocation1 + $0x8] sm:$0xff pattern:$0x75316420]  ;;  %v362_v17 = vld.sshfl [vmem:[#allocation1] sm:$0xff pattern:$0x75316420] }
  0x86   : > { %366 = vrot.lane.b32.xlu1 %v363_v16, %s1107_s25  ;;  %364 = vrot.lane.b32.xlu0 %v362_v17, %s1107_s25  ;;  %372 = vst [vmem:[#allocation1] ss:$2 sm:$0xff] %v1242_v0 }
  0x8d   : > { %v373_v18 = vld.sshfl [vmem:[#allocation1] sm:$0xff pattern:$0x75316420] }
  0x8e   : > { %374 = vrot.lane.b32.xlu1 %v373_v18, %s1107_s25  ;;  %387 = vst [vmem:[#allocation1] ss:$2 sm:$0xff] %v1242_v0 }
  0x95   : > { %v389_v20 = vld.sshfl [vmem:[#allocation1 + $0x8] sm:$0xff pattern:$0x75316420]  ;;  %v388_v21 = vld.sshfl [vmem:[#allocation1] sm:$0xff pattern:$0x75316420] }
  0x96   : > { %392 = vrot.lane.b32.xlu0 %v389_v20, %s1109_s27  ;;  %390 = vrot.lane.b32.xlu2 %v388_v21, %s1109_s27  ;;  %398 = vst [vmem:[#allocation1] ss:$2 sm:$0xff] %v1242_v0 }
  0x9d   : > { %v399_v22 = vld.sshfl [vmem:[#allocation1] sm:$0xff pattern:$0x75316420] }
  0x9e   : > { %411 = vst [vmem:[#allocation1] ss:$2 sm:$0xff] %v1242_v0  ;;  %400 = vrot.lane.b32.xlu2 %v399_v22, %s1109_s27  ;;  %v354_v22 = vsel %vm304_vm3, 1, %v1108_v19 }
  0x9f   : > { %v355_v47 = vperm.slane %v354_v22, 0 }
  0xa0   : > { %v266_v36 = vpop.permute.xlu2 %265 }
  0xa5   : > { %v413_v23 = vld.sshfl [vmem:[#allocation1 + $0x8] sm:$0xff pattern:$0x75316420]  ;;  %v412_v24 = vld.sshfl [vmem:[#allocation1] sm:$0xff pattern:$0x75316420] }
  0xa6   : > { %416 = vrot.lane.b32.xlu1 %v413_v23, %s1110_s28  ;;  %414 = vrot.lane.b32.xlu0 %v412_v24, %s1110_s28  ;;  %422 = vst [vmem:[#allocation1] ss:$2 sm:$0xff] %v1242_v0 }
  0xa8   : > { %v239_v34 = vpop.permute.xlu0 %238 }
  0xad   : > { %v423_v26 = vld.sshfl [vmem:[#allocation1] sm:$0xff pattern:$0x75316420] }
  0xae   : > { %424 = vrot.lane.b32.xlu2 %v423_v26, %s1110_s28  ;;  %452 = vst [vmem:[#allocation1] ss:$2 sm:$0xff] %v450_v25  ;;  %v331_v26 = vperm.slane %v330_v14, 0  ;;  %s781_s28 = scalar_lea.hbm %s1503_s4, %s887_s24 }
  0xb0   : > { %v245_v35 = vpop.permute.xlu1 %244  ;;  %v247_v37 = vpop.permute.xlu0 %246  ;;  %vm1332_vm2 = vcmp.eq.s32.totalorder %v331_v26, 1 }
  0xb1   : > { %v252_v52 = vsel %vm248_vm5, %v239_v34, %v245_v35  ;;  %v249_v55 = vsel %vm248_vm5, %v245_v35, %v247_v37 }
  0xb2   : > { %v261_v59 = vsel %vm259_vm6, %v252_v52, 0.0  ;;  %v262_v62 = vsel %vm260_vm8, %v249_v55, 0.0  ;;  %vm357_vm6 = vcmp.eq.s32.totalorder %v355_v47, 1  ;;  %vm368_vm8 = vcmask 924672  }
  0xb3   : > { %v476_v63 = vmul.f32 -0.5, %v261_v59  ;;  %v1305_v3 = vmul.f32 -0.28867513, %v261_v59  ;;  %v530_v7 = vmul.f32 0.16666667, %v261_v59  ;;  %v477_v10 = vmul.f32 -0.5, %v262_v62 }
  0xb4   : > { %v491_v8 = vmul.f32 0.28867513, %v262_v62  ;;  %v513_v9 = vmul.f32 -0.28867513, %v262_v62  ;;  %v531_v20 = vmul.f32 0.16666667, %v262_v62 }
  0xb5   : > { %v1263_v27 = vld.sshfl [vmem:[#allocation1] sm:$0xff pattern:$0x75316420]  ;;  %v1265_v28 = vld.sshfl [vmem:[#allocation1 + $0x8] sm:$0xff pattern:$0x75316420] }
  0xb6   : > { %465 = vst [vmem:[#allocation1] ss:$2 sm:$0xff] %v450_v25 }
  0xb8   : > { %v296_v39 = vpop.permute.xlu2 %295 }
  0xbd   : > { %v1268_v30 = vld.sshfl [vmem:[#allocation1] sm:$0xff pattern:$0x75316420]  ;;  %v1270_v31 = vld.sshfl [vmem:[#allocation1 + $0x8] sm:$0xff pattern:$0x75316420] }
  0xbe   : > { %546 = vst [vmem:[#allocation1] ss:$2 sm:$0xff] %v544_v29  ;;  %v332_v29 = vperm.slane %v330_v14, 1 }
  0xc0   : > { %v274_v38 = vpop.permute.xlu1 %273  ;;  %v272_v42 = vpop.permute.xlu0 %271  ;;  %vm1336_vm4 = vcmp.eq.s32.totalorder %v332_v29, 1 }
  0xc1   : > { %v298_v44 = vpop.permute.xlu2 %297  ;;  %v276_v60 = vsel %vm275_vm7, %v272_v42, %v274_v38  ;;  %v279_v61 = vsel %vm275_vm7, %v266_v36, %v272_v42  ;;  %vm379_vm7 = vmand %vm378_vm0, %vm254_vm1  ;;  %vm598_vm1 = vcmask 1043456  }
  0xc2   : > { %v285_v4 = vsel %vm283_vm9, %v279_v61, 0.0  ;;  %v286_v5 = vsel %vm284_vm10, %v276_v60, 0.0  ;;  %v300_v6 = vsel %vm299_vm11, %v296_v39, %v298_v44  ;;  %v356_v44 = vperm.slane %v354_v22, 1 }
  0xc3   : > { %v463_v11 = vmul.f32 0.4082483, %v285_v4  ;;  %v464_v12 = vmul.f32 0.4082483, %v286_v5  ;;  %v492_v15 = vmul.f32 -0.57735026, %v285_v4 }
  0xc4   : > { %v493_v16 = vmul.f32 -0.57735026, %v286_v5  ;;  %v312_v17 = vsel %vm1297_vm12, %v300_v6, 0.0  ;;  %v532_v21 = vmul.f32 -0.33333334, %v285_v4  ;;  %vm358_vm5 = vcmp.eq.s32.totalorder %v356_v44, 1 }
  0xc5   : > { %v1272_v32 = vld.sshfl [vmem:[#allocation1] sm:$0xff pattern:$0x75316420]  ;;  %v1274_v33 = vld.sshfl [vmem:[#allocation1 + $0x8] sm:$0xff pattern:$0x75316420]  ;;  %v1322_v36 = vadd.f32 %v1268_v30, %v463_v11 }
  0xc6   : > { %569 = vst [vmem:[#allocation1] ss:$2 sm:$0xff] %v1242_v0  ;;  %v490_v0 = vmul.f32 0.28867513, %v261_v59  ;;  %v1317_v24 = vmul.f32 0.70710677, %v285_v4  ;;  %v534_v45 = vadd.f32 %v532_v21, %v530_v7 }
  0xc7   : > { %v533_v25 = vmul.f32 -0.33333334, %v286_v5  ;;  %v1319_v35 = vmul.f32 0.70710677, %v286_v5  ;;  %v479_v37 = vmul.f32 0.5, %v312_v17  ;;  %v404_v7 = vsel %vm378_vm0, 1, %v1108_v19 }
  0xc8   : > { %v290_v43 = vpop.permute.xlu1 %289  ;;  %v494_v42 = vadd.f32 %v492_v15, %v490_v0  ;;  %v497_v46 = vmul.f32 0.28867513, %v312_v17  ;;  %v537_v49 = vmul.f32 0.16666667, %v312_v17  ;;  %v405_v17 = vperm.slane %v404_v7, 0 }
  0xc9   : > { %v303_v18 = vsel %vm299_vm11, %v290_v43, %v296_v39  ;;  %v1327_v39 = vadd.f32 %v1270_v31, %v464_v12  ;;  %v495_v43 = vadd.f32 %v493_v16, %v491_v8  ;;  %v535_v48 = vadd.f32 %v533_v25, %v531_v20 }
  0xca   : > { %v311_v38 = vsel %vm1301_vm13, %v303_v18, 0.0  ;;  %v1330_v30 = vadd.f32 %v479_v37, %v477_v10  ;;  %v515_v61 = vadd.f32 %v513_v9, %v497_v46  ;;  %vm394_vm9 = vcmask 916480   ;;  %vm428_vm13 = vmand %vm378_vm0, %vm304_vm3 }
  0xcb   : > { %v478_v50 = vmul.f32 0.5, %v311_v38  ;;  %v496_v52 = vmul.f32 0.28867513, %v311_v38  ;;  %v1346_v60 = vadd.f32 %v497_v46, %v495_v43  ;;  %v536_v2 = vmul.f32 0.16666667, %v311_v38 }
  0xcc   : > { %vm407_vm10 = vcmp.eq.s32.totalorder %v405_v17, 1 }
  0xcd   : > { %v1354_v1 = vadd.f32 %v478_v50, %v476_v63  ;;  %v380_v63 = vsel %vm379_vm7, 1, %v1108_v19  ;;  %v514_v11 = vadd.f32 %v1305_v3, %v496_v52  ;;  %vm717_vm7 = vcmask 293888  }
  0xce   : > { %v381_v20 = vperm.slane %v380_v63, 0  ;;  %v382_v21 = vperm.slane %v380_v63, 1 }
  0xd0   : > { %v1295_v58 = vpop.permute.xlu2 %342  ;;  %vm1369_vm11 = vcmp.eq.s32.totalorder %v381_v20, 1  ;;  %vm1373_vm12 = vcmp.eq.s32.totalorder %v382_v21, 1 }
  0xd8   : > { %v1291_v51 = vpop.permute.xlu0 %315  ;;  %v351_v34 = vpop.permute.xlu2 %350 }
  0xd9   : > { %v353_v59 = vsel %vm344_vm15, %v1295_v58, %v351_v34 }
  0xda   : > { %v360_v6 = vsel %vm358_vm5, %v353_v59, 0.0 }
  0xdb   : > { %v439_v9 = vmul.f32 0.70710677, %v360_v6  ;;  %v460_v18 = vmul.f32 0.4082483, %v360_v6  ;;  %v521_v37 = vmul.f32 -0.57735026, %v360_v6 }
  0xdc   : > { %v554_v46 = vmul.f32 -0.33333334, %v360_v6 }
  0xe0   : > { %v1293_v54 = vpop.permute.xlu1 %323  ;;  %v322_v13 = vpop.permute.xlu0 %321 }
  0xe1   : > { %v326_v56 = vsel %vm325_vm14, %v322_v13, %v1293_v54  ;;  %v329_v57 = vsel %vm325_vm14, %v1291_v51, %v322_v13  ;;  %v539_v54 = vadd.f32 %v537_v49, %v535_v48  ;;  %v1356_v51 = vadd.f32 %v496_v52, %v494_v42 }
  0xe2   : > { %v335_v5 = vsel %vm1332_vm2, %v329_v57, 0.0  ;;  %v406_v49 = vperm.slane %v404_v7, 1  ;;  %vm418_vm14 = vcmask 908288  }
  0xe3   : > { %v436_v8 = vmul.f32 -0.70710677, %v335_v5  ;;  %v448_v25 = vmul.f32 0.4082483, %v335_v5  ;;  %v516_v26 = vmul.f32 0.57735026, %v335_v5 }
  0xe4   : > { %v540_v29 = vmul.f32 -0.33333334, %v335_v5  ;;  %vm408_vm3 = vcmp.eq.s32.totalorder %v406_v49, 1  ;;  %v429_v5 = vsel %vm428_vm13, 1, %v1108_v19 }
  0xe5   : > { %v518_v50 = vadd.f32 %v516_v26, %v514_v11  ;;  %v431_v19 = vperm.slane %v429_v5, 1 }
  0xe7   : > { %vm433_vm0 = vcmp.eq.s32.totalorder %v431_v19, 1 }
  0xe8   : > { %v341_v23 = vpop.permute.xlu1 %340 }
  0xe9   : > { %v345_v62 = vsel %vm344_vm15, %v341_v23, %v1295_v58  ;;  %v336_v58 = vsel %vm1336_vm4, %v326_v56, 0.0  ;;  %v538_v23 = vadd.f32 %v536_v2, %v534_v45  ;;  %v571_v2 = vld.sshfl [vmem:[#allocation1 + $0x8] sm:$0xff pattern:$0x75316420] }
  0xea   : > { %v359_v10 = vsel %vm357_vm6, %v345_v62, 0.0  ;;  %v437_v12 = vmul.f32 -0.70710677, %v336_v58  ;;  %v449_v13 = vmul.f32 0.4082483, %v336_v58 }
  0xeb   : > { %v438_v14 = vmul.f32 0.70710677, %v359_v10  ;;  %v517_v15 = vmul.f32 0.57735026, %v336_v58  ;;  %v541_v16 = vmul.f32 -0.33333334, %v336_v58  ;;  %v542_v52 = vadd.f32 %v540_v29, %v538_v23 }
  0xec   : > { %v458_v34 = vadd.f32 %v1265_v28, %v449_v13  ;;  %v441_v3 = vadd.f32 %v439_v9, %v437_v12  ;;  %v457_v28 = vadd.f32 %v1263_v27, %v448_v25  ;;  %v459_v57 = vmul.f32 0.4082483, %v359_v10 }
  0xed   : > { %v440_v38 = vadd.f32 %v438_v14, %v436_v8  ;;  %v519_v42 = vadd.f32 %v517_v15, %v515_v61  ;;  %v543_v43 = vadd.f32 %v541_v16, %v539_v54  ;;  %v520_v58 = vmul.f32 -0.57735026, %v359_v10 }
  0xee   : > { %v577_v56 = vrot.slane %v441_v3, 4  ;;  %v1385_v62 = vadd.f32 %v460_v18, %v458_v34  ;;  %v551_v6 = vadd.f32 %v1272_v32, %v542_v52  ;;  %v553_v7 = vmul.f32 -0.33333334, %v359_v10 }
  0xef   : > { %v576_v59 = vrot.slane %v440_v38, 4  ;;  %v523_v54 = vadd.f32 %v521_v37, %v519_v42  ;;  %v552_v27 = vadd.f32 %v1274_v33, %v543_v43  ;;  %v461_v9 = vadd.f32 %v459_v57, %v457_v28 }
  0xf0   : > { %v391_v4 = vpop.permute.xlu2 %390  ;;  %v1396_v33 = vsel %vm598_vm1, %v571_v2, %v577_v56  ;;  %v430_v13 = vperm.slane %v429_v5, 0  ;;  %v583_v32 = vrot.slane %v1385_v62, 4  ;;  %v522_v16 = vadd.f32 %v520_v58, %v518_v50 }
  0xf1   : > { %v556_v14 = vadd.f32 %v554_v46, %v552_v27  ;;  %v555_v17 = vadd.f32 %v553_v7, %v551_v6  ;;  %v582_v21 = vrot.slane %v461_v9, 4 }
  0xf2   : > { %vm432_vm15 = vcmp.eq.s32.totalorder %v430_v13, 1 }
  0xf8   : > { %v365_v55 = vpop.permute.xlu0 %364  ;;  %v367_v0 = vpop.permute.xlu1 %366 }
  0xf9   : > { %v369_v53 = vsel %vm368_vm8, %v365_v55, %v367_v0  ;;  %v401_v31 = vpop.permute.xlu2 %400 }
  0xfa   : > { %v385_v40 = vsel %vm1369_vm11, %v369_v53, 0.0 }
  0xfb   : > { %v482_v11 = vmul.f32 0.5, %v385_v40  ;;  %v500_v10 = vmul.f32 -0.28867513, %v385_v40  ;;  %v557_v15 = vmul.f32 0.16666667, %v385_v40 }
  0xfd   : > { %v484_v26 = vadd.f32 %v482_v11, %v1354_v1  ;;  %v502_v34 = vadd.f32 %v500_v10, %v1356_v51  ;;  %v524_v3 = vadd.f32 %v522_v16, %v500_v10  ;;  %v559_v37 = vadd.f32 %v557_v15, %v555_v17 }
 0x100   : > { %v375_v48 = vpop.permute.xlu1 %374 }
 0x101   : > { %v377_v55 = vsel %vm368_vm8, %v367_v0, %v375_v48 }
 0x102   : > { %v386_v63 = vsel %vm1373_vm12, %v377_v55, 0.0 }
 0x103   : > { %v483_v18 = vmul.f32 0.5, %v386_v63  ;;  %v501_v29 = vmul.f32 -0.28867513, %v386_v63  ;;  %v558_v38 = vmul.f32 0.16666667, %v386_v63 }
 0x105   : > { %v503_v51 = vadd.f32 %v501_v29, %v1346_v60  ;;  %v525_v57 = vadd.f32 %v523_v54, %v501_v29 }
 0x108   : > { %v393_v22 = vpop.permute.xlu0 %392  ;;  %v425_v25 = vpop.permute.xlu2 %424 }
 0x109   : > { %v395_v44 = vsel %vm394_vm9, %v391_v4, %v393_v22  ;;  %v570_v4 = vld.sshfl [vmem:[#allocation1] sm:$0xff pattern:$0x75316420]  ;;  %v403_v41 = vsel %vm394_vm9, %v393_v22, %v401_v31 }
 0x10a   : > { %v1383_v61 = vsel %vm407_vm10, %v395_v44, 0.0  ;;  %v1399_v0 = vsel %vm598_vm1, %v570_v4, %v576_v59  ;;  %v410_v12 = vsel %vm408_vm3, %v403_v41, 0.0 }
 0x10b   : > { %v444_v8 = vmul.f32 -0.70710677, %v1383_v61  ;;  %v607_v22 = vadd.f32 %v1396_v33, %v1399_v0  ;;  %v445_v23 = vmul.f32 -0.70710677, %v410_v12  ;;  %v472_v48 = vmul.f32 0.4082483, %v1383_v61 }
 0x10c   : > { %v504_v53 = vmul.f32 0.57735026, %v1383_v61  ;;  %v473_v31 = vmul.f32 0.4082483, %v410_v12  ;;  %v505_v4 = vmul.f32 0.57735026, %v410_v12 }
 0x10d   : > { %v446_v20 = vadd.f32 %v444_v8, %v1317_v24  ;;  %v485_v24 = vadd.f32 %v483_v18, %v1330_v30  ;;  %v447_v1 = vadd.f32 %v445_v23, %v1319_v35  ;;  %v474_v2 = vadd.f32 %v472_v48, %v1322_v36 }
 0x10e   : > { %v561_v35 = vmul.f32 -0.33333334, %v1383_v61  ;;  %v506_v58 = vadd.f32 %v504_v53, %v502_v34  ;;  %v475_v6 = vadd.f32 %v473_v31, %v1327_v39  ;;  %v562_v7 = vmul.f32 -0.33333334, %v410_v12 }
 0x10f   : > { %v1411_v44 = vsel %vm598_vm1, %v446_v20, %v582_v21  ;;  %v602_v60 = vsel %vm598_vm1, %v447_v1, %v583_v32  ;;  %v560_v36 = vadd.f32 %v558_v38, %v556_v14  ;;  %v507_v13 = vadd.f32 %v505_v4, %v503_v51 }
 0x110   : > { %v608_v30 = vadd.f32 %v607_v22, %v1411_v44  ;;  %v563_v61 = vadd.f32 %v561_v35, %v559_v37 }
 0x111   : > { %v564_v20 = vadd.f32 %v562_v7, %v560_v36 }
 0x112   : > { %v609_v8 = vadd.f32 %v608_v30, %v602_v60 }
 0x118   : > { %v417_v42 = vpop.permute.xlu1 %416  ;;  %v415_v43 = vpop.permute.xlu0 %414 }
 0x119   : > { %v419_v46 = vsel %vm418_vm14, %v415_v43, %v417_v42  ;;  %v427_v47 = vsel %vm418_vm14, %v417_v42, %v425_v25 }
 0x11a   : > { %v434_v45 = vsel %vm432_vm15, %v419_v46, 0.0  ;;  %v435_v49 = vsel %vm433_vm0, %v427_v47, 0.0 }
 0x11b   : > { %v486_v28 = vmul.f32 -0.5, %v434_v45  ;;  %v526_v50 = vmul.f32 0.28867513, %v434_v45  ;;  %v487_v52 = vmul.f32 -0.5, %v435_v49  ;;  %v527_v56 = vmul.f32 0.28867513, %v435_v49 }
 0x11c   : > { %v508_v55 = vmul.f32 -0.28867513, %v434_v45  ;;  %v565_v54 = vmul.f32 0.16666667, %v434_v45  ;;  %v509_v63 = vmul.f32 -0.28867513, %v435_v49 }
 0x11d   : > { %v488_v59 = vadd.f32 %v486_v28, %v484_v26  ;;  %v528_v62 = vadd.f32 %v526_v50, %v524_v3  ;;  %v489_v27 = vadd.f32 %v487_v52, %v485_v24  ;;  %v529_v41 = vadd.f32 %v527_v56, %v525_v57 }
 0x11e   : > { %v510_v10 = vadd.f32 %v508_v55, %v506_v58  ;;  %v566_v15 = vmul.f32 0.16666667, %v435_v49  ;;  %v511_v18 = vadd.f32 %v509_v63, %v507_v13  ;;  %v567_v39 = vadd.f32 %v565_v54, %v563_v61 }
 0x11f   : > { %v588_v40 = vrot.slane %v488_v59, 4  ;;  %v589_v5 = vrot.slane %v489_v27, 4  ;;  %v594_v9 = vrot.slane %v528_v62, 4  ;;  %v595_v32 = vrot.slane %v529_v41, 4 }
 0x120   : > { %v568_v22 = vadd.f32 %v566_v15, %v564_v20  ;;  %v614_v14 = vsel %vm598_vm1, %v567_v39, 0.0  ;;  %v1111_v3 = vmov 9216.0  }
 0x121   : > { %v603_v11 = vsel %vm598_vm1, %v474_v2, %v588_v40  ;;  %v604_v16 = vsel %vm598_vm1, %v475_v6, %v589_v5  ;;  %v605_v12 = vsel %vm598_vm1, %v510_v10, %v594_v9  ;;  %v606_v23 = vsel %vm598_vm1, %v511_v18, %v595_v32 }
 0x122   : > { %v610_v19 = vadd.f32 %v609_v8, %v603_v11  ;;  %v616_v29 = vsel %vm598_vm1, %v568_v22, 0.0  ;;  %965 = vrcp.f32 %v1111_v3 }
 0x124   : > { %v611_v17 = vadd.f32 %v610_v19, %v604_v16 }
 0x126   : > { %v612_v21 = vadd.f32 %v611_v17, %v605_v12 }
 0x128   : > { %v613_v25 = vadd.f32 %v612_v21, %v606_v23  ;;  %v966_v37 = vpop.eup %965 }
 0x129   : > { %v628_v38 = vmul.f32 9216.0, %v966_v37  ;;  %vm632_vm2 = vweird.f32 %v966_v37 }
 0x12a   : > { %v615_v26 = vadd.f32 %v614_v14, %v613_v25 }
 0x12b   : > { %v629_v42 = vsub.f32 1.0, %v628_v38 }
 0x12c   : > { %v617_v34 = vadd.f32 %v616_v29, %v615_v26  ;;  %v711_v26 = vld [vmem:[%s1502_s3] sm:$0xff] }
 0x12d   : > { %v630_v47 = vmul.f32 %v966_v37, %v629_v42  ;;  %714 = vperm.xlu2 %963, %v711_v26  }
 0x12e   : > { %618 = vadd.xlane.f32.xlu0 %v617_v34 }
 0x12f   : > { %v631_v45 = vadd.f32 %v966_v37, %v630_v47 }
 0x131   : > { %v633_v28 = vsel %vm632_vm2, %v966_v37, %v631_v45 }
 0x187   : > { %v715_v45 = vpop.permute.xlu2 %714 }
 0x1a1   : > { %v619_v43 = vpop.xlane.xlu0 %618 }
 0x1a2   : > { %v620_v24 = vrot.slane %v619_v43, 4 }
 0x1a4   : > { %v621_v46 = vadd.f32 %v620_v24, %v619_v43 }
 0x1a6   : > { %v622_v48 = vrot.slane %v621_v46, 2 }
 0x1a8   : > { %v623_v1 = vadd.f32 %v622_v48, %v621_v46 }
 0x1aa   : > { %v624_v49 = vrot.slane %v623_v1, 1 }
 0x1ac   : > { %v625_v51 = vadd.f32 %v624_v49, %v623_v1  ;;  %v710_v1 = vld [vmem:[%s1501_s2] sm:$0xff] }
 0x1ae   : > { %888 = vpush %v625_v51 }
 0x1af   : > { %890 = vpush %v633_v28 }
 0x1df   : > { %s889_s30 = spop %888 }
 0x1e0   : > { %s1428_s5 = spop %890 }
 0x1e1   : > { %s635_s9 = smul.f32 %s1428_s5, %s889_s30  ;;  %s230_s30 = scalar_lea.vmem [#allocation7], %s876_s23 }
 0x1e3   : > { %v636_v50 = vstv %s635_s9  ;;  %s785_s9 = sshll.u32 %s781_s28, 4  ;;  %s786_s9 = int_to_ptr.hbm [resolvable:$true] %s785_s9 }
 0x1e4   : > { %v1432_v52 = vsub.f32 %v1399_v0, %v636_v50  ;;  %v1435_v53 = vsub.f32 %v1396_v33, %v636_v50  ;;  %v1438_v30 = vsub.f32 %v1411_v44, %v636_v50  ;;  %v1444_v57 = vsub.f32 %v602_v60, %v636_v50 }
 0x1e5   : > { %v641_v59 = vsub.f32 %v603_v11, %v636_v50  ;;  %v642_v27 = vsub.f32 %v604_v16, %v636_v50  ;;  %v643_v44 = vsub.f32 %v605_v12, %v636_v50  ;;  %v645_v55 = vsub.f32 %v567_v39, %v636_v50 }
 0x1e6   : > { %v647_v31 = vmul.f32 %v1432_v52, %v1432_v52  ;;  %v648_v56 = vmul.f32 %v1435_v53, %v1435_v53  ;;  %v649_v62 = vmul.f32 %v1438_v30, %v1438_v30  ;;  %v650_v33 = vmul.f32 %v1444_v57, %v1444_v57 }
 0x1e7   : > { %v651_v35 = vmul.f32 %v641_v59, %v641_v59  ;;  %v644_v40 = vsub.f32 %v606_v23, %v636_v50  ;;  %v652_v41 = vmul.f32 %v642_v27, %v642_v27  ;;  %v646_v58 = vsub.f32 %v568_v22, %v636_v50 }
 0x1e8   : > { %v657_v0 = vadd.f32 %v648_v56, %v647_v31  ;;  %v653_v60 = vmul.f32 %v643_v44, %v643_v44  ;;  %v655_v7 = vmul.f32 %v645_v55, %v645_v55 }
 0x1e9   : > { %v654_v8 = vmul.f32 %v644_v40, %v644_v40  ;;  %v656_v9 = vmul.f32 %v646_v58, %v646_v58 }
 0x1ea   : > { %v658_v2 = vadd.f32 %v657_v0, %v649_v62  ;;  %v664_v11 = vsel %vm598_vm1, %v655_v7, 0.0 }
 0x1eb   : > { %v666_v13 = vsel %vm598_vm1, %v656_v9, 0.0 }
 0x1ec   : > { %v659_v4 = vadd.f32 %v658_v2, %v650_v33 }
 0x1ee   : > { %v660_v5 = vadd.f32 %v659_v4, %v651_v35 }
 0x1f0   : > { %v661_v6 = vadd.f32 %v660_v5, %v652_v41 }
 0x1f2   : > { %v662_v54 = vadd.f32 %v661_v6, %v653_v60 }
 0x1f4   : > { %v663_v63 = vadd.f32 %v662_v54, %v654_v8 }
 0x1f6   : > { %v665_v36 = vadd.f32 %v664_v11, %v663_v63 }
 0x1f8   : > { %v667_v61 = vadd.f32 %v666_v13, %v665_v36 }
 0x1fa   : > { %668 = vadd.xlane.f32.xlu1 %v667_v61 }
 0x26d   : > { %v669_v19 = vpop.xlane.xlu1 %668 }
 0x26e   : > { %v670_v10 = vrot.slane %v669_v19, 4 }
 0x270   : > { %v671_v32 = vadd.f32 %v670_v10, %v669_v19 }
 0x272   : > { %v672_v15 = vrot.slane %v671_v32, 2 }
 0x274   : > { %v673_v16 = vadd.f32 %v672_v15, %v671_v32 }
 0x276   : > { %v674_v17 = vrot.slane %v673_v16, 1 }
 0x278   : > { %v675_v18 = vadd.f32 %v674_v17, %v673_v16 }
 0x27a   : > { %892 = vpush %v675_v18 }
 0x2ab   : > { %s893_s10 = spop %892 }
 0x2ac   : > { %s685_s11 = smul.f32 %s893_s10, %s1428_s5  ;;  %s783_s5 = sshll.u32 %s230_s30, 4  ;;  %s784_s5 = int_to_ptr.vmem [resolvable:$true] %s783_s5 }
 0x2ad   : > { %s770_s10 = scalar_lea.sflag [#allocation4], %s1230_s8 }
 0x2ae   : > { %s686_s12 = sadd.f32 1e-05, %s685_s11  ;;  %s1043_s11 = sshra.s32 %s786_s9, 4  ;;  %s1044_s11 = int_to_ptr.hbm [resolvable:$true] %s1043_s11 }
 0x2af   : > { %s1045_s19 = scalar_lea.hbm %s1044_s11, 16  ;;  %p1050_p9 = scmp.lt.s32.totalorder %s1044_s11, %s1503_s4 }
 0x2b0   : > { %v687_v20 = vstv %s686_s12  ;;  %p1046_p1 = scmp.ne.s32.totalorder %s1044_s11, %s1045_s19  ;;  %p1051_p10 = scmp.lt.s32.totalorder %s1049_s20, %s1045_s19 }
 0x2b1   : > { %967 = vrsqrt.f32 %v687_v20  ;;  %vm694_vm5 = vweird.f32 %v687_v20 }
 0x2b2   : > { %p1047_p4 = pnand %p1046_p1, %p1203_p3  ;;  %p1052_p2 = por %p1051_p10, %p1050_p9 }
 0x2b4   : > { %p1048_p8 = pneg %p1047_p4 }
 0x2b6   : > { %p1053_p11 = pnand %p1052_p2, %p1048_p8 }
 0x2b7   : > { %v968_v39 = vpop.eup %967 }
 0x2b8   : > { %v689_v12 = vmul.f32 %v968_v39, %v687_v20  ;;  %vm695_vm4 = vweird.f32 %v968_v39 }
 0x2b9   : > { %vm696_vm6 = vmor %vm694_vm5, %vm695_vm4 }
 0x2ba   : > { %v690_v21 = vmul.f32 %v968_v39, %v689_v12 }
 0x2bc   : > { %v691_v22 = vmul.f32 0.5, %v690_v21 }
 0x2be   : > { %v692_v23 = vsub.f32 1.5, %v691_v22 }
 0x2c0   : > { %v693_v25 = vmul.f32 %v968_v39, %v692_v23 }
 0x2c2   : > { %v697_v14 = vsel %vm696_vm6, %v968_v39, %v693_v25 }
 0x2c3   : > { %894 = vpush %v697_v14 }
 0x2f4   : > { %s895_s26 = spop %894 }
 0x2f5   : > { %v699_v29 = vstv %s895_s26 }
 0x2f6   : > { %v708_v34 = vmul.f32 %v699_v29, %v645_v55  ;;  %v709_v3 = vmul.f32 %v699_v29, %v646_v58  ;;  %v706_v37 = vmul.f32 %v699_v29, %v643_v44  ;;  %v707_v38 = vmul.f32 %v699_v29, %v644_v40 }
 0x2f7   : > { %v704_v42 = vmul.f32 %v699_v29, %v641_v59  ;;  %v705_v43 = vmul.f32 %v699_v29, %v642_v27  ;;  %v702_v24 = vmul.f32 %v699_v29, %v1438_v30  ;;  %v703_v46 = vmul.f32 %v699_v29, %v1444_v57 }
 0x2f8   : > { %877 = vmatpush.msk.msra.mxu0 %vm598_vm1, %v708_v34  ;;  %879 = vmatpush.msk.msra.mxu1 %vm598_vm1, %v709_v3  ;;  %v700_v47 = vmul.f32 %v699_v29, %v1432_v52  ;;  %v701_v48 = vmul.f32 %v699_v29, %v1435_v53 }
 0x2fa   : > { %739 = vmatpush.msra.mxu0 %v706_v37  ;;  %759 = vmatpush.msra.mxu1 %v707_v38 }
 0x2fc   : > { %740 = vmatpush.msra.mxu0 %v704_v42  ;;  %760 = vmatpush.msra.mxu1 %v705_v43 }
 0x2fe   : > { %741 = vmatpush.msra.mxu0 %v702_v24  ;;  %761 = vmatpush.msra.mxu1 %v703_v46 }
 0x300   : > { %742 = vmatpush.msra.mxu0 %v700_v47  ;;  %762 = vmatpush.msra.mxu1 %v701_v48 }
 0x301   : > { %878 = vmatmul.msk.f32.vlgmr.msra.gmra.mxu0 %vm717_vm7, %v710_v1  ;;  %880 = vmatmul.msk.f32.vlgmr.msra.gmra.mxu1 %vm717_vm7, %v710_v1 }
 0x37e   : > { %v744_v49 = vpop.f32.mrf.mxu0  ;;  %v764_v51 = vpop.f32.mrf.mxu1 }
 0x37f   : > { %v745_v28 = vadd.f32 %v744_v49, %v715_v45  ;;  %v765_v50 = vadd.f32 %v764_v51, %v715_v45 }
 0x381   : > { %767 = vst [vmem:[%s230_s30] sm:$0xff] %v745_v28 }
 0x382   : > { %768 = vst [vmem:[%s230_s30 + $0x8] sm:$0xff] %v765_v50 }
 0x383   : > { %1056 = shalt.err (!%p1053_p11)
}
 0x384   : > { %902 = dma.vmem_to_hbm [thread:$0]  (%p1203_p3), %s784_s5, 256, %s786_s9, %s770_s10  }
 0x385 PF: > { %s797_s8 = sand.u32 1, %s1087_s15   ;;  %p1521_p12 = scmp.ge.s32.totalorder %s1099_s18, 2 }
 0x386   : > { %s798_s14 = scalar_lea.sflag [#allocation4], %s797_s8 }
 0x387   : > { %p913_p13 = pnand %p1521_p12, %p1172_p6 }
 0x389   : > { %p914_p0 = pneg %p913_p13 }
 0x38b   : > { %1082 = dma.done.wait (%p914_p0), %s798_s14, 256  }
 0x38c   : > { %1084 = vsyncadd (%p914_p0), %s798_s14, 4294967040  ;;  %p18_p5 = scmp.ge.s32.totalorder %s1190_s29, 4   ;;  %s1522_s15 = smov %s1091_s16 }
 0x38d   : > { %s1523_s16 = smov %s1095_s17  ;;  %s1524_s17 = smov %s1199_s6 }
 0x38e   : > { %s1525_s18 = smov %s1190_s29  ;;  %20 = sbr.rel (!%p18_p5) target bundleno = 6 (0x6), region = 86 }
 0x393   :  { %804 = vsyncpa [#allocation3], 1 }
 0x394   :  { %806 = vsyncpa [#allocation3 + $0x1], 1 }
 0x395   :  { %807 = vsyncpa [#allocation6], 1 }
 0x396   :  { %808 = vsyncpa [#allocation4], 1 }
 0x397   :  { %810 = vsyncpa [#allocation4 + $0x1], 1 }

</bundles_post_ra>
